<compile_context>
chip_gen: v7x
topology: tpu7x:2x2x1
jax: 0.10.0
libtpu: 0.0.40
codegen_flags: <defaults>
</compile_context>

<pallas_src>
import jax
import jax.numpy as jnp
from jax.experimental import pallas as pl
from jax.experimental.pallas import tpu as pltpu


# ------------------------- fused ConvPosEnc kernel ---------------------------
def _conv_pos_enc_kernel(q_ref, wq_ref, bq_ref, c_ref, wc_ref, bc_ref,
                         qo_ref, co_ref):
    def dw3_residual(x_ref, w_ref, b_ref, o_ref):
        x = x_ref[...].astype(jnp.float32)              # (Bt, N, C)
        w = w_ref[...].astype(jnp.float32)[:, None, :]  # (3, 1, C) taps [n-1, n, n+1]
        b = b_ref[...].astype(jnp.float32)              # (1, C)
        zero = jnp.zeros_like(x[:, :1, :])
        # zero-padded shifts along the sequence (sublane) axis
        x_prev = jnp.concatenate([zero, x[:, :-1, :]], axis=1)   # x[n-1]
        x_next = jnp.concatenate([x[:, 1:, :], zero], axis=1)    # x[n+1]
        conv = x_prev * w[0] + x * w[1] + x_next * w[2] + b
        o_ref[...] = (x + conv).astype(o_ref.dtype)

    dw3_residual(q_ref, wq_ref, bq_ref, qo_ref)
    dw3_residual(c_ref, wc_ref, bc_ref, co_ref)


def conv_pos_enc_pallas(q, content, wq, bq, wc, bc, *, vmem_budget_bytes=8 << 20):
    """Fused (depthwise conv1d k=3 + residual) for q and content.

    q:       (B, N, dim_q)        wq: (3, dim_q)       bq: (dim_q,)
    content: (B, N, dim_content)  wc: (3, dim_content) bc: (dim_content,)
    Returns (q_out, content_out) with the same shapes/dtypes as the inputs.
    """
    B, N, Dq = q.shape
    Bc, Nc, Dc = content.shape
    assert (B, N) == (Bc, Nc), "q and content must share (batch, seq)"

    # Largest batch tile that divides B and keeps double-buffered in+out slabs
    # under a conservative VMEM budget (sized for v7x's smaller VMEM).
    itemsize = max(q.dtype.itemsize, content.dtype.itemsize)
    per_b = N * (Dq + Dc) * itemsize * 2 * 2          # in+out, double buffered
    block_b = max(1, min(B, vmem_budget_bytes // max(per_b, 1)))
    while B % block_b:
        block_b -= 1
    # TODO(synk): for very long sequences with B==1, add sequence-axis tiling
    # with a 1-row halo; batch tiling alone keeps the kernel simple here.

    wq2 = wq.reshape(3, Dq)
    bq2 = bq.reshape(1, Dq)
    wc2 = wc.reshape(3, Dc)
    bc2 = bc.reshape(1, Dc)

    q_out, c_out = pl.pallas_call(
        _conv_pos_enc_kernel,
        out_shape=(jax.ShapeDtypeStruct((B, N, Dq), q.dtype),
                   jax.ShapeDtypeStruct((B, N, Dc), content.dtype)),
        grid_spec=pltpu.PrefetchScalarGridSpec(
            num_scalar_prefetch=0,
            grid=(B // block_b,),
            in_specs=[
                pl.BlockSpec((block_b, N, Dq), lambda i: (i, 0, 0)),
                pl.BlockSpec((3, Dq), lambda i: (0, 0)),   # taps stay resident
                pl.BlockSpec((1, Dq), lambda i: (0, 0)),
                pl.BlockSpec((block_b, N, Dc), lambda i: (i, 0, 0)),
                pl.BlockSpec((3, Dc), lambda i: (0, 0)),
                pl.BlockSpec((1, Dc), lambda i: (0, 0)),
            ],
            out_specs=(
                pl.BlockSpec((block_b, N, Dq), lambda i: (i, 0, 0)),
                pl.BlockSpec((block_b, N, Dc), lambda i: (i, 0, 0)),
            ),
        ),
        compiler_params=pltpu.CompilerParams(dimension_semantics=("parallel",)),
    )(q, wq2, bq2, content, wc2, bc2)
    return q_out, c_out


# ------------------------------ module wrapper --------------------------------
class ConvPosEncPallas:
    """Mirrors torch ConvPosEnc(dim_q, dim_content, k=3)."""

    def __init__(self, dim_q, dim_content, k=3, key=None):
        assert k == 3  # TODO(synk): generalize taps beyond kernel_size=3
        key = jax.random.PRNGKey(0) if key is None else key
        kq, kbq, kc, kbc = jax.random.split(key, 4)
        bound = 1.0 / (k ** 0.5)   # torch Conv1d default init, fan_in = k (depthwise)
        self.wq = jax.random.uniform(kq, (k, dim_q), jnp.float32, -bound, bound)
        self.bq = jax.random.uniform(kbq, (dim_q,), jnp.float32, -bound, bound)
        self.wc = jax.random.uniform(kc, (k, dim_content), jnp.float32, -bound, bound)
        self.bc = jax.random.uniform(kbc, (dim_content,), jnp.float32, -bound, bound)

    def __call__(self, q, content):
        return conv_pos_enc_pallas(q, content, self.wq, self.bq, self.wc, self.bc)


# ---------------------------------- main ---------------------------------------
if __name__ == "__main__":
    B, N, DIM_Q, DIM_C = 2, 16, 128, 256   # lane-multiple channel dims

    key = jax.random.PRNGKey(0)
    kq, kc, kp = jax.random.split(key, 3)
    q = jax.random.normal(kq, (B, N, DIM_Q), jnp.float32)
    content = jax.random.normal(kc, (B, N, DIM_C), jnp.float32)

    mod = ConvPosEncPallas(DIM_Q, DIM_C, k=3, key=kp)
    q_out, c_out = mod(q, content)
    jax.block_until_ready((q_out, c_out))

    # pure-JAX reference: depthwise cross-correlation (torch Conv1d semantics)
    def dwconv_residual_ref(x, w, b):
        _, _, C = x.shape
        lhs = jnp.transpose(x, (0, 2, 1))               # (B, C, N)
        rhs = jnp.transpose(w, (1, 0))[:, None, :]      # (C, 1, 3)
        y = jax.lax.conv_general_dilated(
            lhs, rhs, window_strides=(1,), padding=[(1, 1)],
            dimension_numbers=("NCH", "OIH", "NCH"),
            feature_group_count=C)
        y = y + b[None, :, None]
        return jnp.transpose(y, (0, 2, 1)) + x

    q_ref = dwconv_residual_ref(q, mod.wq, mod.bq)
    c_ref = dwconv_residual_ref(content, mod.wc, mod.bc)

    assert q_out.shape == (B, N, DIM_Q) and c_out.shape == (B, N, DIM_C)
    assert jnp.max(jnp.abs(q_out - q_ref)) < 1e-4
    assert jnp.max(jnp.abs(c_out - c_ref)) < 1e-4

    print("KERNEL_OK")
</pallas_src>

<mosaic_0001>
module attributes {stable_mosaic.version = 11 : i64} {
  func.func @_conv_pos_enc_kernel(%arg0: i32, %arg1: memref<2x16x128xf32, #tpu.memory_space<vmem>>, %arg2: memref<3x128xf32, #tpu.memory_space<vmem>>, %arg3: memref<1x128xf32, #tpu.memory_space<vmem>>, %arg4: memref<2x16x256xf32, #tpu.memory_space<vmem>>, %arg5: memref<3x256xf32, #tpu.memory_space<vmem>>, %arg6: memref<1x256xf32, #tpu.memory_space<vmem>>, %arg7: memref<2x16x128xf32, #tpu.memory_space<vmem>>, %arg8: memref<2x16x256xf32, #tpu.memory_space<vmem>>) attributes {dimension_semantics = [#tpu.dimension_semantics<parallel>], iteration_bounds = array<i64: 1>, scalar_prefetch = 0 : i64, scratch_operands = 0 : i64, tpu.core_type = #tpu.core_type<tc>, window_params = [{transform_indices = @transform_0, window_bounds = array<i64: 2, 16, 128>}, {pipeline_mode = #tpu.pipeline_mode<synchronous>, transform_indices = @transform_1, window_bounds = array<i64: 3, 128>}, {pipeline_mode = #tpu.pipeline_mode<synchronous>, transform_indices = @transform_2, window_bounds = array<i64: 1, 128>}, {transform_indices = @transform_3, window_bounds = array<i64: 2, 16, 256>}, {pipeline_mode = #tpu.pipeline_mode<synchronous>, transform_indices = @transform_4, window_bounds = array<i64: 3, 256>}, {pipeline_mode = #tpu.pipeline_mode<synchronous>, transform_indices = @transform_5, window_bounds = array<i64: 1, 256>}, {transform_indices = @transform_6, window_bounds = array<i64: 2, 16, 128>}, {transform_indices = @transform_7, window_bounds = array<i64: 2, 16, 256>}]} {
    %c0 = arith.constant 0 : index
    %c0_0 = arith.constant 0 : index
    %c0_1 = arith.constant 0 : index
    %0 = vector.load %arg1[%c0, %c0_0, %c0_1] : memref<2x16x128xf32, #tpu.memory_space<vmem>>, vector<2x16x128xf32>
    %c0_2 = arith.constant 0 : index
    %c0_3 = arith.constant 0 : index
    %1 = vector.load %arg2[%c0_2, %c0_3] : memref<3x128xf32, #tpu.memory_space<vmem>>, vector<3x128xf32>
    %2 = vector.shape_cast %1 : vector<3x128xf32> to vector<3x1x128xf32>
    %c0_4 = arith.constant 0 : index
    %c0_5 = arith.constant 0 : index
    %3 = vector.load %arg3[%c0_4, %c0_5] : memref<1x128xf32, #tpu.memory_space<vmem>>, vector<1x128xf32>
    %cst = arith.constant 0.000000e+00 : f32
    %4 = vector.broadcast %cst : f32 to vector<2x1x128xf32>
    %5 = vector.extract_strided_slice %0 {offsets = [0, 0, 0], sizes = [2, 15, 128], strides = [1, 1, 1]} : vector<2x16x128xf32> to vector<2x15x128xf32>
    %6 = tpu.concatenate %4, %5 in 1 : vector<2x1x128xf32>, vector<2x15x128xf32> -> vector<2x16x128xf32>
    %7 = vector.extract_strided_slice %0 {offsets = [0, 1, 0], sizes = [2, 15, 128], strides = [1, 1, 1]} : vector<2x16x128xf32> to vector<2x15x128xf32>
    %8 = tpu.concatenate %7, %4 in 1 : vector<2x15x128xf32>, vector<2x1x128xf32> -> vector<2x16x128xf32>
    %9 = vector.extract_strided_slice %2 {offsets = [0, 0, 0], sizes = [1, 1, 128], strides = [1, 1, 1]} : vector<3x1x128xf32> to vector<1x1x128xf32>
    %10 = vector.shape_cast %9 : vector<1x1x128xf32> to vector<1x128xf32>
    %11 = vector.shape_cast %10 : vector<1x128xf32> to vector<1x1x128xf32>
    %12 = vector.broadcast %11 : vector<1x1x128xf32> to vector<2x16x128xf32>
    %13 = arith.mulf %6, %12 : vector<2x16x128xf32>
    %14 = vector.extract_strided_slice %2 {offsets = [1, 0, 0], sizes = [1, 1, 128], strides = [1, 1, 1]} : vector<3x1x128xf32> to vector<1x1x128xf32>
    %15 = vector.shape_cast %14 : vector<1x1x128xf32> to vector<1x128xf32>
    %16 = vector.shape_cast %15 : vector<1x128xf32> to vector<1x1x128xf32>
    %17 = vector.broadcast %16 : vector<1x1x128xf32> to vector<2x16x128xf32>
    %18 = arith.mulf %0, %17 : vector<2x16x128xf32>
    %19 = arith.addf %13, %18 : vector<2x16x128xf32>
    %20 = vector.extract_strided_slice %2 {offsets = [2, 0, 0], sizes = [1, 1, 128], strides = [1, 1, 1]} : vector<3x1x128xf32> to vector<1x1x128xf32>
    %21 = vector.shape_cast %20 : vector<1x1x128xf32> to vector<1x128xf32>
    %22 = vector.shape_cast %21 : vector<1x128xf32> to vector<1x1x128xf32>
    %23 = vector.broadcast %22 : vector<1x1x128xf32> to vector<2x16x128xf32>
    %24 = arith.mulf %8, %23 : vector<2x16x128xf32>
    %25 = arith.addf %19, %24 : vector<2x16x128xf32>
    %26 = vector.shape_cast %3 : vector<1x128xf32> to vector<1x1x128xf32>
    %27 = vector.broadcast %26 : vector<1x1x128xf32> to vector<2x16x128xf32>
    %28 = arith.addf %25, %27 : vector<2x16x128xf32>
    %29 = arith.addf %0, %28 : vector<2x16x128xf32>
    %c0_6 = arith.constant 0 : index
    %c0_7 = arith.constant 0 : index
    %c0_8 = arith.constant 0 : index
    %30 = vector.load %arg7[%c0_6, %c0_7, %c0_8] : memref<2x16x128xf32, #tpu.memory_space<vmem>>, vector<2x16x128xf32>
    tpu.vector_store %arg7[%c0_6, %c0_7, %c0_8], %29 {strides = array<i32>} : memref<2x16x128xf32, #tpu.memory_space<vmem>>, vector<2x16x128xf32>,
    %c0_9 = arith.constant 0 : index
    %c0_10 = arith.constant 0 : index
    %c0_11 = arith.constant 0 : index
    %31 = vector.load %arg4[%c0_9, %c0_10, %c0_11] : memref<2x16x256xf32, #tpu.memory_space<vmem>>, vector<2x16x256xf32>
    %c0_12 = arith.constant 0 : index
    %c0_13 = arith.constant 0 : index
    %32 = vector.load %arg5[%c0_12, %c0_13] : memref<3x256xf32, #tpu.memory_space<vmem>>, vector<3x256xf32>
    %33 = vector.shape_cast %32 : vector<3x256xf32> to vector<3x1x256xf32>
    %c0_14 = arith.constant 0 : index
    %c0_15 = arith.constant 0 : index
    %34 = vector.load %arg6[%c0_14, %c0_15] : memref<1x256xf32, #tpu.memory_space<vmem>>, vector<1x256xf32>
    %cst_16 = arith.constant 0.000000e+00 : f32
    %35 = vector.broadcast %cst_16 : f32 to vector<2x1x256xf32>
    %36 = vector.extract_strided_slice %31 {offsets = [0, 0, 0], sizes = [2, 15, 256], strides = [1, 1, 1]} : vector<2x16x256xf32> to vector<2x15x256xf32>
    %37 = tpu.concatenate %35, %36 in 1 : vector<2x1x256xf32>, vector<2x15x256xf32> -> vector<2x16x256xf32>
    %38 = vector.extract_strided_slice %31 {offsets = [0, 1, 0], sizes = [2, 15, 256], strides = [1, 1, 1]} : vector<2x16x256xf32> to vector<2x15x256xf32>
    %39 = tpu.concatenate %38, %35 in 1 : vector<2x15x256xf32>, vector<2x1x256xf32> -> vector<2x16x256xf32>
    %40 = vector.extract_strided_slice %33 {offsets = [0, 0, 0], sizes = [1, 1, 256], strides = [1, 1, 1]} : vector<3x1x256xf32> to vector<1x1x256xf32>
    %41 = vector.shape_cast %40 : vector<1x1x256xf32> to vector<1x256xf32>
    %42 = vector.shape_cast %41 : vector<1x256xf32> to vector<1x1x256xf32>
    %43 = vector.broadcast %42 : vector<1x1x256xf32> to vector<2x16x256xf32>
    %44 = arith.mulf %37, %43 : vector<2x16x256xf32>
    %45 = vector.extract_strided_slice %33 {offsets = [1, 0, 0], sizes = [1, 1, 256], strides = [1, 1, 1]} : vector<3x1x256xf32> to vector<1x1x256xf32>
    %46 = vector.shape_cast %45 : vector<1x1x256xf32> to vector<1x256xf32>
    %47 = vector.shape_cast %46 : vector<1x256xf32> to vector<1x1x256xf32>
    %48 = vector.broadcast %47 : vector<1x1x256xf32> to vector<2x16x256xf32>
    %49 = arith.mulf %31, %48 : vector<2x16x256xf32>
    %50 = arith.addf %44, %49 : vector<2x16x256xf32>
    %51 = vector.extract_strided_slice %33 {offsets = [2, 0, 0], sizes = [1, 1, 256], strides = [1, 1, 1]} : vector<3x1x256xf32> to vector<1x1x256xf32>
    %52 = vector.shape_cast %51 : vector<1x1x256xf32> to vector<1x256xf32>
    %53 = vector.shape_cast %52 : vector<1x256xf32> to vector<1x1x256xf32>
    %54 = vector.broadcast %53 : vector<1x1x256xf32> to vector<2x16x256xf32>
    %55 = arith.mulf %39, %54 : vector<2x16x256xf32>
    %56 = arith.addf %50, %55 : vector<2x16x256xf32>
    %57 = vector.shape_cast %34 : vector<1x256xf32> to vector<1x1x256xf32>
    %58 = vector.broadcast %57 : vector<1x1x256xf32> to vector<2x16x256xf32>
    %59 = arith.addf %56, %58 : vector<2x16x256xf32>
    %60 = arith.addf %31, %59 : vector<2x16x256xf32>
    %c0_17 = arith.constant 0 : index
    %c0_18 = arith.constant 0 : index
    %c0_19 = arith.constant 0 : index
    %61 = vector.load %arg8[%c0_17, %c0_18, %c0_19] : memref<2x16x256xf32, #tpu.memory_space<vmem>>, vector<2x16x256xf32>
    tpu.vector_store %arg8[%c0_17, %c0_18, %c0_19], %60 {strides = array<i32>} : memref<2x16x256xf32, #tpu.memory_space<vmem>>, vector<2x16x256xf32>,
    return
  }
  func.func @transform_0(%arg0: i32) -> (i32, i32, i32) {
    %c0_i32 = arith.constant 0 : i32
    %c0_i32_0 = arith.constant 0 : i32
    %c0_i32_1 = arith.constant 0 : i32
    return %arg0, %c0_i32, %c0_i32_0 : i32, i32, i32
  }
  func.func @transform_1(%arg0: i32) -> (i32, i32) {
    %c0_i32 = arith.constant 0 : i32
    %c0_i32_0 = arith.constant 0 : i32
    %c0_i32_1 = arith.constant 0 : i32
    return %c0_i32, %c0_i32_0 : i32, i32
  }
  func.func @transform_2(%arg0: i32) -> (i32, i32) {
    %c0_i32 = arith.constant 0 : i32
    %c0_i32_0 = arith.constant 0 : i32
    %c0_i32_1 = arith.constant 0 : i32
    return %c0_i32, %c0_i32_0 : i32, i32
  }
  func.func @transform_3(%arg0: i32) -> (i32, i32, i32) {
    %c0_i32 = arith.constant 0 : i32
    %c0_i32_0 = arith.constant 0 : i32
    %c0_i32_1 = arith.constant 0 : i32
    return %arg0, %c0_i32, %c0_i32_0 : i32, i32, i32
  }
  func.func @transform_4(%arg0: i32) -> (i32, i32) {
    %c0_i32 = arith.constant 0 : i32
    %c0_i32_0 = arith.constant 0 : i32
    %c0_i32_1 = arith.constant 0 : i32
    return %c0_i32, %c0_i32_0 : i32, i32
  }
  func.func @transform_5(%arg0: i32) -> (i32, i32) {
    %c0_i32 = arith.constant 0 : i32
    %c0_i32_0 = arith.constant 0 : i32
    %c0_i32_1 = arith.constant 0 : i32
    return %c0_i32, %c0_i32_0 : i32, i32
  }
  func.func @transform_6(%arg0: i32) -> (i32, i32, i32) {
    %c0_i32 = arith.constant 0 : i32
    %c0_i32_0 = arith.constant 0 : i32
    %c0_i32_1 = arith.constant 0 : i32
    return %arg0, %c0_i32, %c0_i32_0 : i32, i32, i32
  }
  func.func @transform_7(%arg0: i32) -> (i32, i32, i32) {
    %c0_i32 = arith.constant 0 : i32
    %c0_i32_0 = arith.constant 0 : i32
    %c0_i32_1 = arith.constant 0 : i32
    return %arg0, %c0_i32, %c0_i32_0 : i32, i32, i32
  }
}

</mosaic_0001>

<bundles_post_ra>
// kernel: tpu_custom_call.1
= control target key start
LH: loop header
LB: loop body
LE: loop exit
PB: predicated region body
PF: predicated region fallthrough
CT: control target
= control target key end

     0   :  { %13 = vsyncpa [#allocation3], 0  ;;  %s800_s0 = inlined_call_operand.hbm [shape: f32[2,16,128], index: 0, kind: input, shape index: {}]   ;;  %s801_s1 = inlined_call_operand.hbm [shape: f32[3,128], index: 1, kind: input, shape index: {}]   ;;  %s802_s2 = inlined_call_operand.vmem [shape: f32[1,128], index: 2, kind: input, shape index: {}]   ;;  %s803_s3 = inlined_call_operand.hbm [shape: f32[2,16,256], index: 3, kind: input, shape index: {}]   ;;  %s804_s4 = inlined_call_operand.vmem [shape: f32[3,256], index: 4, kind: input, shape index: {}]   ;;  %s805_s5 = inlined_call_operand.vmem [shape: f32[1,256], index: 5, kind: input, shape index: {}]   ;;  %s806_s6 = inlined_call_operand.hbm [shape: f32[2,16,128], index: 6, kind: output, shape index: {0}]   ;;  %s807_s7 = inlined_call_operand.hbm [shape: f32[2,16,256], index: 7, kind: output, shape index: {1}]  }
   0x1   :  { %14 = vsyncpa [#allocation6], 0 }
   0x2   :  { %15 = vsyncpa [#allocation4], 0 }
   0x3   :  { %16 = vsyncpa [#allocation10], 0  ;;  %s510_s24 = smov [#allocation5]   ;;  %s511_s26 = smov [#allocation2]  }
   0x4   :  { %s35_s25 = sshll.u32 %s510_s24, 4  ;;  %s22_s27 = sshll.u32 %s511_s26, 4  ;;  %s36_s25 = int_to_ptr.vmem [resolvable:$true] %s35_s25  ;;  %s559_s27 = int_to_ptr.vmem [resolvable:$true] %s22_s27 }
   0x5   :  { %s392_s30 = scalar_lea.hbm %s801_s1, 64 }
   0x6   :  { %p393_p0 = scmp.ne.s32.totalorder %s801_s1, %s392_s30  ;;  %p396_p1 = scmp.lt.u32.totalorder %s392_s30, %s801_s1 }
   0x8   :  { %p398_p2 = pnand %p396_p1, %p393_p0 }
   0xa   :  { %401 = shalt.err (!%p398_p2)
}
   0xb   :  { %s402_s12 = scalar_lea.vmem %s36_s25, 64  ;;  %p407_p4 = scmp.lt.s32.totalorder %s36_s25, %s36_s25 }
   0xc   :  { %p403_p3 = scmp.ne.s32.totalorder %s36_s25, %s402_s12  ;;  %p408_p5 = scmp.lt.s32.totalorder %s402_s12, %s402_s12 }
   0xe   :  { %p409_p6 = por %p408_p5, %p407_p4 }
  0x10   :  { %p410_p7 = pnand %p409_p6, %p403_p3 }
  0x12   :  { %413 = shalt.err (!%p410_p7)
}
  0x13   :  { %38 = dma.hbm_to_vmem [thread:$0]  %s801_s1, 64, %s36_s25, [#allocation6]  }
  0x14   :  { %s414_s17 = scalar_lea.hbm %s800_s0, 512 }
  0x15   :  { %p415_p8 = scmp.ne.s32.totalorder %s800_s0, %s414_s17  ;;  %p418_p9 = scmp.lt.u32.totalorder %s414_s17, %s800_s0 }
  0x17   :  { %p420_p10 = pnand %p418_p9, %p415_p8 }
  0x19   :  { %423 = shalt.err (!%p420_p10)
}
  0x1a   :  { %s424_s22 = scalar_lea.vmem %s559_s27, 512  ;;  %p429_p12 = scmp.lt.s32.totalorder %s559_s27, %s559_s27 }
  0x1b   :  { %p425_p11 = scmp.ne.s32.totalorder %s559_s27, %s424_s22  ;;  %p430_p13 = scmp.lt.s32.totalorder %s424_s22, %s424_s22 }
  0x1d   :  { %p431_p0 = por %p430_p13, %p429_p12 }
  0x1f   :  { %p432_p1 = pnand %p431_p0, %p425_p11 }
  0x21   :  { %435 = shalt.err (!%p432_p1)
}
  0x22   :  { %s512_s1 = smov 128   ;;  %s513_s23 = smov 8  }
  0x23   :  { %28 = dma.hbm_to_vmem [thread:$0]  %s800_s0, 512, %s559_s27, [#allocation3], %s512_s1, %s512_s1, %s513_s23  }
  0x24   :  { %s514_s26 = smov [#allocation7]   ;;  %s436_s8 = scalar_lea.hbm %s803_s3, 1024 }
  0x25   :  { %s46_s28 = sshll.u32 %s514_s26, 4  ;;  %p437_p2 = scmp.ne.s32.totalorder %s803_s3, %s436_s8  ;;  %s47_s28 = int_to_ptr.vmem [resolvable:$true] %s46_s28 }
  0x26   :  { %p440_p3 = scmp.lt.u32.totalorder %s436_s8, %s803_s3 }
  0x28   :  { %p442_p4 = pnand %p440_p3, %p437_p2 }
  0x2a   :  { %445 = shalt.err (!%p442_p4)
}
  0x2b   :  { %s446_s13 = scalar_lea.vmem %s47_s28, 1024  ;;  %p451_p6 = scmp.lt.s32.totalorder %s47_s28, %s47_s28 }
  0x2c   :  { %p447_p5 = scmp.ne.s32.totalorder %s47_s28, %s446_s13  ;;  %p452_p7 = scmp.lt.s32.totalorder %s446_s13, %s446_s13 }
  0x2e   :  { %p453_p8 = por %p452_p7, %p451_p6 }
  0x30   :  { %p454_p9 = pnand %p453_p8, %p447_p5 }
  0x32   :  { %457 = shalt.err (!%p454_p9)
}
  0x33   :  { %s515_s0 = smov 256   ;;  %s516_s27 = smov 16  }
  0x34   :  { %52 = dma.hbm_to_vmem [thread:$0]  %s803_s3, 1024, %s47_s28, [#allocation6], %s515_s0, %s515_s0, %s516_s27  }
  0x35   :  { %502 = dma.done.wait [#allocation3], 512  }
  0x36   :  { %503 = vsyncadd [#allocation3], 4294966784 }
  0x37   :  { %504 = dma.done.wait [#allocation6], 1088  }
  0x38   :  { %505 = vsyncadd [#allocation6], 4294966208  ;;  %v102_v0 = vlaneseq  ;;  %vm76_vm0 = vcmask 1040384   ;;  %vm89_vm1 = vcmask 1046528   ;;  %v66_v6 = vld [vmem:[#allocation2] sm:$0xff]  ;;  %v67_v7 = vld [vmem:[#allocation2 + $0x8] sm:$0xff] }
  0x39   :  { %v70_v8 = vld [vmem:[#allocation5] sm:$0x7]  ;;  %v77_v11 = vrot.slane %v66_v6, 7  ;;  %v90_v12 = vrot.slane %v66_v6, 1  ;;  %v91_v13 = vrot.slane %v67_v7, 1  ;;  %v68_v15 = vld [vmem:[#allocation2 + $0x10] sm:$0xff] }
  0x3a   :  { %v608_v1 = vshrl.u32 %v102_v0, 7  ;;  %v78_v18 = vrot.slane %v67_v7, 7  ;;  %v80_v19 = vrot.slane %v68_v15, 7  ;;  %v93_v23 = vrot.slane %v68_v15, 1  ;;  %v629_v28 = vld [vmem:[#allocation2 + $0x18] sm:$0xff]  ;;  %v631_v29 = vld [vmem:[#allocation7] sm:$0xff] }
  0x3b   :  { %v87_v20 = vsel %vm76_vm0, 0.0, %v77_v11  ;;  %v92_v21 = vsel %vm89_vm1, %v90_v12, %v91_v13  ;;  %v100_v22 = vsel %vm89_vm1, %v91_v13, 0.0  ;;  %v94_v35 = vrot.slane %v629_v28, 1  ;;  %v382_v38 = vld [vmem:[%s802_s2] ss:$0 sm:$0xff]  ;;  %v647_v54 = vld [vmem:[#allocation7 + $0x10] sm:$0xff] }
  0x3c   :  { %v611_v2 = vsub.s32 0, %v608_v1  ;;  %v614_v3 = vsub.s32 1, %v608_v1  ;;  %v617_v4 = vsub.s32 2, %v608_v1  ;;  %v225_v5 = vsub.s32 4, %v608_v1  ;;  %v160_v47 = vld [vmem:[%s804_s4] sm:$0x77] }
  0x3d   :  { %v251_v9 = vsub.s32 5, %v608_v1  ;;  %v285_v10 = vsub.s32 6, %v608_v1  ;;  %v79_v27 = vsel %vm76_vm0, %v77_v11, %v78_v18  ;;  %v88_v33 = vsel %vm76_vm0, 0.0, %v80_v19  ;;  %v161_v59 = vld [vmem:[%s805_s5] sm:$0x3]  ;;  %v660_v11 = vld [vmem:[#allocation7 + $0x8] sm:$0xff] }
  0x3e   :  { %v105_v14 = vrot.slane %v70_v8, %v611_v2  ;;  %v113_v16 = vrot.slane %v70_v8, %v614_v3  ;;  %v125_v17 = vrot.slane %v70_v8, %v617_v4  ;;  %v81_v40 = vrot.slane %v629_v28, 7  ;;  %s517_s4 = smov [#allocation8]  }
  0x3f   :  { %v170_v42 = vrot.slane %v631_v29, 7  ;;  %v95_v44 = vsel %vm89_vm1, %v93_v23, %v94_v35  ;;  %v101_v46 = vsel %vm89_vm1, %v94_v35, 0.0  ;;  %v194_v56 = vrot.slane %v631_v29, 1  ;;  %s353_s5 = sshll.u32 %s517_s4, 4  ;;  %s696_s5 = int_to_ptr.vmem [resolvable:$true] %s353_s5 }
  0x40   :  { %v106_v24 = vmul.f32 %v105_v14, %v87_v20  ;;  %v114_v25 = vmul.f32 %v113_v16, %v66_v6  ;;  %v126_v26 = vmul.f32 %v125_v17, %v92_v21  ;;  %v107_v30 = vmul.f32 %v105_v14, %v79_v27  ;;  %v676_v21 = vld [vmem:[#allocation7 + $0x18] sm:$0xff]  ;;  %s458_s20 = scalar_lea.vmem %s696_s5, 512  ;;  %p463_p11 = scmp.lt.s32.totalorder %s696_s5, %s696_s5 }
  0x41   :  { %v115_v31 = vmul.f32 %v113_v16, %v67_v7  ;;  %v127_v32 = vmul.f32 %v125_v17, %v100_v22  ;;  %v108_v36 = vmul.f32 %v105_v14, %v88_v33  ;;  %v116_v37 = vmul.f32 %v113_v16, %v68_v15  ;;  %p459_p10 = scmp.ne.s32.totalorder %s696_s5, %s458_s20  ;;  %p464_p12 = scmp.lt.s32.totalorder %s458_s20, %s458_s20 }
  0x42   :  { %v118_v34 = vadd.f32 %v114_v25, %v106_v24  ;;  %v117_v41 = vmul.f32 %v113_v16, %v629_v28  ;;  %v128_v49 = vmul.f32 %v125_v17, %v95_v44  ;;  %v82_v50 = vsel %vm76_vm0, %v80_v19, %v81_v40 }
  0x43   :  { %v119_v39 = vadd.f32 %v115_v31, %v107_v30  ;;  %v120_v45 = vadd.f32 %v116_v37, %v108_v36  ;;  %v129_v51 = vmul.f32 %v125_v17, %v101_v46  ;;  %v109_v53 = vmul.f32 %v105_v14, %v82_v50  ;;  %p465_p13 = por %p464_p12, %p463_p11 }
  0x44   :  { %v130_v43 = vadd.f32 %v126_v26, %v118_v34  ;;  %v190_v55 = vsel %vm76_vm0, 0.0, %v170_v42  ;;  %v195_v60 = vrot.slane %v647_v54, 1  ;;  %v222_v61 = vrot.slane %v160_v47, %v611_v2 }
  0x45   :  { %v131_v48 = vadd.f32 %v127_v32, %v119_v39  ;;  %v132_v58 = vadd.f32 %v128_v49, %v120_v45  ;;  %v121_v63 = vadd.f32 %v117_v41, %v109_v53  ;;  %v248_v0 = vrot.slane %v160_v47, %v614_v3  ;;  %v719_v41 = vld [vmem:[#allocation7 + $0x20] sm:$0xff]  ;;  %p466_p0 = pnand %p465_p13, %p459_p10 }
  0x46   :  { %v140_v52 = vadd.f32 %v382_v38, %v130_v43  ;;  %v282_v8 = vrot.slane %v160_v47, %v617_v4  ;;  %v196_v14 = vsel %vm89_vm1, %v194_v56, %v195_v60  ;;  %v664_v16 = vrot.slane %v222_v61, %v611_v2 }
  0x47   :  { %v141_v57 = vadd.f32 %v382_v38, %v131_v48  ;;  %v142_v13 = vadd.f32 %v382_v38, %v132_v58  ;;  %v133_v17 = vadd.f32 %v129_v51, %v121_v63  ;;  %v667_v18 = vrot.slane %v248_v0, %v614_v3 }
  0x48   :  { %v144_v62 = vadd.f32 %v140_v52, %v66_v6  ;;  %v670_v6 = vrot.slane %v282_v8, %v617_v4  ;;  %v673_v19 = vrot.slane %v161_v59, %v611_v2  ;;  %v171_v22 = vrot.slane %v660_v11, 7 }
  0x49   :  { %v145_v12 = vadd.f32 %v141_v57, %v67_v7  ;;  %v146_v20 = vadd.f32 %v142_v13, %v68_v15  ;;  %v237_v7 = vmul.f32 %v664_v16, %v190_v55  ;;  %v197_v23 = vrot.slane %v660_v11, 1 }
  0x4a   :  { %148 = vst [vmem:[#allocation8] sm:$0xff] %v144_v62  ;;  %v143_v24 = vadd.f32 %v382_v38, %v133_v17  ;;  %v263_v25 = vmul.f32 %v667_v18, %v631_v29  ;;  %v297_v26 = vmul.f32 %v670_v6, %v196_v14  ;;  %v198_v27 = vrot.slane %v676_v21, 1 }
  0x4b   :  { %149 = vst [vmem:[#allocation8 + $0x8] sm:$0xff] %v145_v12  ;;  %150 = vst [vmem:[#allocation8 + $0x10] sm:$0xff] %v146_v20  ;;  %v191_v15 = vsel %vm76_vm0, 0.0, %v171_v22  ;;  %v226_v30 = vrot.slane %v160_v47, %v225_v5  ;;  %v252_v31 = vrot.slane %v160_v47, %v251_v9  ;;  %v286_v32 = vrot.slane %v160_v47, %v285_v10 }
  0x4c   :  { %v147_v33 = vadd.f32 %v143_v24, %v629_v28  ;;  %v271_v34 = vadd.f32 %v263_v25, %v237_v7  ;;  %v199_v35 = vsel %vm89_vm1, %v197_v23, %v198_v27  ;;  %v694_v36 = vrot.slane %v161_v59, %v614_v3 }
  0x4d   :  { %v699_v5 = vrot.slane %v226_v30, %v611_v2  ;;  %v702_v9 = vrot.slane %v252_v31, %v614_v3  ;;  %v705_v1 = vrot.slane %v286_v32, %v617_v4  ;;  %v172_v10 = vrot.slane %v647_v54, 7 }
  0x4e   :  { %151 = vst [vmem:[#allocation8 + $0x18] sm:$0xff] %v147_v33  ;;  %v305_v28 = vadd.f32 %v297_v26, %v271_v34  ;;  %v214_v37 = vsel %vm89_vm1, %v195_v60, 0.0  ;;  %v265_v38 = vmul.f32 %v667_v18, %v647_v54  ;;  %v174_v39 = vrot.slane %v676_v21, 7 }
  0x4f   :  { %v238_v2 = vmul.f32 %v699_v5, %v191_v15  ;;  %v264_v3 = vmul.f32 %v702_v9, %v660_v11  ;;  %v298_v40 = vmul.f32 %v705_v1, %v199_v35  ;;  %v173_v4 = vsel %vm76_vm0, %v170_v42, %v172_v10 }
  0x50   :  { %469 = shalt.err (!%p466_p0)
}
  0x51   :  { %s470_s24 = scalar_lea.hbm %s806_s6, 512 }
  0x52   :  { %p471_p1 = scmp.ne.s32.totalorder %s806_s6, %s470_s24  ;;  %p474_p2 = scmp.lt.u32.totalorder %s470_s24, %s806_s6 }
  0x54   :  { %p476_p3 = pnand %p474_p2, %p471_p1 }
  0x56   :  { %479 = shalt.err (!%p476_p3)
}
  0x57   :  { %359 = dma.vmem_to_hbm [thread:$0]  %s696_s5, 512, %s806_s6, [#allocation4], %s512_s1, %s512_s1, %s513_s23   ;;  %v324_v42 = vadd.f32 %v673_v19, %v305_v28  ;;  %v239_v43 = vmul.f32 %v664_v16, %v173_v4  ;;  %v299_v44 = vmul.f32 %v670_v6, %v214_v37  ;;  %v175_v45 = vsel %vm76_vm0, %v171_v22, %v174_v39  ;;  %v157_v50 = vld [vmem:[#allocation7 + $0x28] sm:$0xff]  ;;  %v158_v55 = vld [vmem:[#allocation7 + $0x30] sm:$0xff]  ;;  %v159_v20 = vld [vmem:[#allocation7 + $0x38] sm:$0xff] }
  0x58   :  { %v272_v46 = vadd.f32 %v264_v3, %v238_v2  ;;  %v215_v47 = vsel %vm89_vm1, %v198_v27, 0.0  ;;  %v240_v48 = vmul.f32 %v699_v5, %v175_v45  ;;  %v266_v49 = vmul.f32 %v702_v9, %v676_v21  ;;  %s518_s6 = smov [#allocation9]  }
  0x59   :  { %v332_v51 = vadd.f32 %v324_v42, %v631_v29  ;;  %v273_v52 = vadd.f32 %v265_v38, %v239_v43  ;;  %v300_v53 = vmul.f32 %v705_v1, %v215_v47  ;;  %v176_v56 = vrot.slane %v719_v41, 7  ;;  %s365_s1 = sshll.u32 %s518_s6, 4  ;;  %s366_s1 = int_to_ptr.vmem [resolvable:$true] %s365_s1 }
  0x5a   :  { %v306_v57 = vadd.f32 %v298_v40, %v272_v46  ;;  %v274_v58 = vadd.f32 %v266_v49, %v240_v48  ;;  %v200_v59 = vrot.slane %v719_v41, 1  ;;  %v201_v60 = vrot.slane %v158_v55, 1  ;;  %s480_s23 = scalar_lea.vmem %s366_s1, 1024  ;;  %p485_p5 = scmp.lt.s32.totalorder %s366_s1, %s366_s1 }
  0x5b   :  { %340 = vst [vmem:[#allocation9] sm:$0xff] %v332_v51  ;;  %v307_v61 = vadd.f32 %v299_v44, %v273_v52  ;;  %v192_v62 = vsel %vm76_vm0, 0.0, %v176_v56  ;;  %v267_v63 = vmul.f32 %v667_v18, %v719_v41  ;;  %v177_v0 = vrot.slane %v157_v50, 7  ;;  %p481_p4 = scmp.ne.s32.totalorder %s366_s1, %s480_s23  ;;  %p486_p6 = scmp.lt.s32.totalorder %s480_s23, %s480_s23 }
  0x5c   :  { %v325_v29 = vadd.f32 %v694_v36, %v306_v57  ;;  %v308_v8 = vadd.f32 %v300_v53, %v274_v58  ;;  %v202_v12 = vsel %vm89_vm1, %v200_v59, %v201_v60  ;;  %v241_v13 = vmul.f32 %v664_v16, %v192_v62 }
  0x5d   :  { %v326_v14 = vadd.f32 %v673_v19, %v307_v61  ;;  %v301_v17 = vmul.f32 %v670_v6, %v202_v12  ;;  %v193_v7 = vsel %vm76_vm0, 0.0, %v177_v0  ;;  %v203_v22 = vrot.slane %v157_v50, 1  ;;  %p487_p7 = por %p486_p6, %p485_p5 }
  0x5e   :  { %v333_v23 = vadd.f32 %v325_v29, %v660_v11  ;;  %v327_v24 = vadd.f32 %v694_v36, %v308_v8  ;;  %v275_v25 = vadd.f32 %v267_v63, %v241_v13  ;;  %v204_v26 = vrot.slane %v159_v20, 1 }
  0x5f   :  { %v334_v27 = vadd.f32 %v326_v14, %v647_v54  ;;  %v242_v15 = vmul.f32 %v699_v5, %v193_v7  ;;  %v268_v30 = vmul.f32 %v702_v9, %v157_v50  ;;  %v178_v31 = vrot.slane %v158_v55, 7  ;;  %p488_p8 = pnand %p487_p7, %p481_p4 }
  0x60   :  { %341 = vst [vmem:[#allocation9 + $0x8] sm:$0xff] %v333_v23  ;;  %v335_v32 = vadd.f32 %v327_v24, %v676_v21  ;;  %v309_v33 = vadd.f32 %v301_v17, %v275_v25  ;;  %v205_v34 = vsel %vm89_vm1, %v203_v22, %v204_v26  ;;  %v216_v35 = vsel %vm89_vm1, %v201_v60, 0.0 }
  0x61   :  { %342 = vst [vmem:[#allocation9 + $0x10] sm:$0xff] %v334_v27  ;;  %v276_v11 = vadd.f32 %v268_v30, %v242_v15  ;;  %v302_v10 = vmul.f32 %v705_v1, %v205_v34  ;;  %v179_v28 = vsel %vm76_vm0, %v176_v56, %v178_v31  ;;  %v269_v54 = vmul.f32 %v667_v18, %v158_v55 }
  0x62   :  { %343 = vst [vmem:[#allocation9 + $0x18] sm:$0xff] %v335_v32  ;;  %v328_v37 = vadd.f32 %v673_v19, %v309_v33  ;;  %v243_v38 = vmul.f32 %v664_v16, %v179_v28  ;;  %v303_v21 = vmul.f32 %v670_v6, %v216_v35  ;;  %v180_v39 = vrot.slane %v159_v20, 7 }
  0x63   :  { %v310_v2 = vadd.f32 %v302_v10, %v276_v11  ;;  %v217_v3 = vsel %vm89_vm1, %v204_v26, 0.0  ;;  %v270_v40 = vmul.f32 %v702_v9, %v159_v20 }
  0x64   :  { %v336_v4 = vadd.f32 %v328_v37, %v719_v41  ;;  %v277_v42 = vadd.f32 %v269_v54, %v243_v38  ;;  %v181_v43 = vsel %vm76_vm0, %v177_v0, %v180_v39  ;;  %v304_v45 = vmul.f32 %v705_v1, %v217_v3 }
  0x65   :  { %v329_v18 = vadd.f32 %v694_v36, %v310_v2  ;;  %v244_v44 = vmul.f32 %v699_v5, %v181_v43 }
  0x66   :  { %344 = vst [vmem:[#allocation9 + $0x20] sm:$0xff] %v336_v4  ;;  %v311_v16 = vadd.f32 %v303_v21, %v277_v42 }
  0x67   :  { %v337_v6 = vadd.f32 %v329_v18, %v157_v50  ;;  %v278_v46 = vadd.f32 %v270_v40, %v244_v44 }
  0x68   :  { %v330_v47 = vadd.f32 %v673_v19, %v311_v16 }
  0x69   :  { %345 = vst [vmem:[#allocation9 + $0x28] sm:$0xff] %v337_v6  ;;  %v312_v48 = vadd.f32 %v304_v45, %v278_v46 }
  0x6a   :  { %v338_v9 = vadd.f32 %v330_v47, %v158_v55 }
  0x6b   :  { %v331_v41 = vadd.f32 %v694_v36, %v312_v48 }
  0x6c   :  { %346 = vst [vmem:[#allocation9 + $0x30] sm:$0xff] %v338_v9 }
  0x6d   :  { %v339_v49 = vadd.f32 %v331_v41, %v159_v20 }
  0x6f   :  { %347 = vst [vmem:[#allocation9 + $0x38] sm:$0xff] %v339_v49 }
  0x70   :  { %491 = shalt.err (!%p488_p8)
}
  0x71   :  { %s492_s11 = scalar_lea.hbm %s807_s7, 1024 }
  0x72   :  { %p493_p9 = scmp.ne.s32.totalorder %s807_s7, %s492_s11  ;;  %p496_p10 = scmp.lt.u32.totalorder %s492_s11, %s807_s7 }
  0x74   :  { %p498_p11 = pnand %p496_p10, %p493_p9 }
  0x76   :  { %501 = shalt.err (!%p498_p11)
}
  0x77   :  { %371 = dma.vmem_to_hbm [thread:$0]  %s366_s1, 1024, %s807_s7, [#allocation10], %s515_s0, %s515_s0, %s516_s27  }
  0x78   :  { %506 = dma.done.wait [#allocation4], 512  }
  0x79   :  { %507 = vsyncadd [#allocation4], 4294966784 }
  0x7a   :  { %508 = dma.done.wait [#allocation10], 1024  }
  0x7b   :  { %509 = vsyncadd [#allocation10], 4294966272 }
  0x7c   :  { %378 = vsyncpa [#allocation3], 1 }
  0x7d   :  { %379 = vsyncpa [#allocation6], 1 }
  0x7e   :  { %380 = vsyncpa [#allocation4], 1 }
  0x7f   :  { %381 = vsyncpa [#allocation10], 1 }

</bundles_post_ra>
